<compile_context>
chip_gen: v6e
topology: v6e:2x2x1
jax: 0.10.0
libtpu: 0.0.40
codegen_flags: <defaults>
</compile_context>

<pallas_src>
import jax
import jax.numpy as jnp
from jax.experimental import pallas as pl
from jax.experimental.pallas import tpu as pltpu


def _round_up(x: int, m: int) -> int:
    return (x + m - 1) // m * m


def _num_tensorcores() -> int:
    """Best-effort count of TensorCores behind one JAX device (megacore chips -> 2)."""
    try:
        kind = jax.devices()[0].device_kind.lower()
    except Exception:
        return 1
    if any(tag in kind for tag in ("v7", "7x", "v4", "v5p")):
        return 2
    return 1


def _const_spec(shape, single_buffer: bool):
    """BlockSpec for a grid-invariant operand (same block every step)."""
    idx = lambda i: (0, 0)
    if single_buffer:
        try:
            # Constants never change across the grid: skip double-buffering them.
            return pl.BlockSpec(shape, idx, pipeline_mode=pl.Buffered(1))
        except TypeError:  # older jax without pipeline_mode support
            pass
    return pl.BlockSpec(shape, idx)


# --------------------------------------------------------------------------------------
# Kernel
# --------------------------------------------------------------------------------------
def two_tower_kernel(xt_ref, w1t_ref, w2t_ref, b2_ref, out_ref):
    """One batch tile of the fused two-tower forward (feature-major layout).

    xt_ref : (Kin, tb)  bf16  columns are examples; rows = [user_feats ; item_feats ; 1]
    w1t_ref: (2H, Kin)  bf16  block-diag [[Wu1^T, 0], [0, Wi1^T]] with [bu1 ; bi1]
                              folded into the trailing (ones) column
    w2t_ref: (2E, 2H)   bf16  block-diag [[Wu2^T, 0], [0, Wi2^T]]
    b2_ref : (2E, 1)    f32   [bu2 ; bi2]
    out_ref: (1, tb)    f32   sigmoid scores (lane-dense row)
    """
    # Layer 1 of BOTH towers (bias folded in) in one MXU pass, f32 accumulation.
    h = jnp.dot(w1t_ref[...], xt_ref[...], preferred_element_type=jnp.float32)
    # ReLU in bf16 (bit-identical to relu-then-cast); feeds matmul 2 directly.
    h = jnp.maximum(h.astype(jnp.bfloat16), 0.0)                     # (2H, tb) bf16

    # Layer 2 of BOTH towers in one MXU pass -> [user_emb ; item_emb] per column.
    emb = jnp.dot(w2t_ref[...], h, preferred_element_type=jnp.float32) + b2_ref[...]

    E = emb.shape[0] // 2
    prod = emb[:E, :] * emb[E:, :]                                   # (E, tb) f32
    score = jnp.sum(prod, axis=0, keepdims=True)                     # (1, tb) f32, XLU reduce

    # Stable sigmoid: sigmoid(x) = 0.5 * (tanh(x/2) + 1); tanh lands on the EUP.
    out_ref[...] = 0.5 * jnp.tanh(0.5 * score) + 0.5


# --------------------------------------------------------------------------------------
# One-time weight packing (hoisted out of the per-call path)
# --------------------------------------------------------------------------------------
def pack_params(params):
    """Pack both towers into one feature-major, block-diagonal bf16 network.

    Call this ONCE per parameter set and reuse the result across forward calls.
    """
    f32, bf16 = jnp.float32, jnp.bfloat16
    wu1 = jnp.asarray(params["wu1"], f32); bu1 = jnp.asarray(params["bu1"], f32).reshape(-1)
    wu2 = jnp.asarray(params["wu2"], f32); bu2 = jnp.asarray(params["bu2"], f32).reshape(-1)
    wi1 = jnp.asarray(params["wi1"], f32); bi1 = jnp.asarray(params["bi1"], f32).reshape(-1)
    wi2 = jnp.asarray(params["wi2"], f32); bi2 = jnp.asarray(params["bi2"], f32).reshape(-1)

    U_in, H = wu1.shape
    I_in, _ = wi1.shape
    E = wu2.shape[1]
    Kin = U_in + I_in + 1                     # +1: constant ones row folds b1 into matmul 1

    w1t = jnp.zeros((2 * H, Kin), f32)
    w1t = (w1t.at[:H, :U_in].set(wu1.T)
               .at[H:, U_in:U_in + I_in].set(wi1.T)
               .at[:H, Kin - 1].set(bu1)
               .at[H:, Kin - 1].set(bi1))

    w2t = jnp.zeros((2 * E, 2 * H), f32)
    w2t = w2t.at[:E, :H].set(wu2.T).at[E:, H:].set(wi2.T)
    b2 = jnp.concatenate([bu2, bi2]).reshape(2 * E, 1)

    return {"w1t": w1t.astype(bf16), "w2t": w2t.astype(bf16), "b2": b2}


# --------------------------------------------------------------------------------------
# Forward wrapper
# --------------------------------------------------------------------------------------
def two_tower_forward(user_input, item_input, packed, *, tb=None, num_cores=None):
    """Fused two-tower forward. `packed` comes from pack_params(). Returns (batch,) scores."""
    B, U_in = user_input.shape
    B2, I_in = item_input.shape
    assert B == B2, "user_input and item_input must have the same batch size"

    w1t, w2t, b2 = packed["w1t"], packed["w2t"], packed["b2"]
    H2, Kin = w1t.shape                       # (2H, Kin)
    E2 = w2t.shape[0]                         # 2E
    assert Kin == U_in + I_in + 1, "packed params do not match the input feature sizes"

    if num_cores is None:
        num_cores = _num_tensorcores()

    # ---- generation-aware batch-tile selection ----
    if tb is None:
        if num_cores >= 2:
            # Megacore (v7x / v4 / v5p): an even >=2-step split so both TCs get work.
            per_core = pl.cdiv(max(B, 1), 2)
            steps_per_core = pl.cdiv(per_core, 4096)            # keep <= ~4096 cols / step
            tb = _round_up(pl.cdiv(per_core, steps_per_core), 128)
        else:
            # Single TensorCore (v5e / v6e): one grid step whenever it fits comfortably.
            tb = min(2048, _round_up(max(B, 1), 128))
    assert tb % 128 == 0, "tb must be a multiple of 128 (lane-dense output blocks)"

    Bp = _round_up(max(B, 1), tb)
    if num_cores >= 2:
        Bp = max(Bp, 2 * tb)                  # force >= 2 grid steps on megacore chips
    nb = Bp // tb

    # ---- bf16 prep (cast BEFORE concat / pad / transpose), feature-major layout ----
    bf16 = jnp.bfloat16
    x = jnp.concatenate(
        [user_input.astype(bf16), item_input.astype(bf16), jnp.ones((B, 1), bf16)],
        axis=1)                               # (B, Kin) bf16
    if Bp != B:
        x = jnp.pad(x, ((0, Bp - B), (0, 0)))
    xt = x.T                                  # (Kin, Bp) bf16

    multi_step = nb > 1
    out = pl.pallas_call(
        two_tower_kernel,
        out_shape=jax.ShapeDtypeStruct((1, Bp), jnp.float32),
        grid_spec=pltpu.PrefetchScalarGridSpec(
            num_scalar_prefetch=0,
            grid=(nb,),
            in_specs=[
                pl.BlockSpec((Kin, tb), lambda i: (0, i)),   # fused [user;item;1] tile
                _const_spec((H2, Kin), multi_step),          # block-diag W1^T + b1 (bf16)
                _const_spec((E2, H2), multi_step),           # block-diag W2^T (bf16)
                _const_spec((E2, 1), multi_step),            # [bu2 ; bi2] (f32)
            ],
            out_specs=pl.BlockSpec((1, tb), lambda i: (0, i)),   # lane-dense score row
        ),
        compiler_params=pltpu.CompilerParams(
            dimension_semantics=("parallel",)),
    )(xt, w1t, w2t, b2)

    return out[0, :B]


# --------------------------------------------------------------------------------------
# Reference + parameter init
# --------------------------------------------------------------------------------------
def init_params(key, user_input_size, item_input_size, embedding_size=64, hidden=128):
    """Deterministic synthetic parameters (shapes mirror nn.Linear, stored as (in, out))."""
    ks = jax.random.split(key, 8)
    s = 0.05
    return {
        "wu1": s * jax.random.normal(ks[0], (user_input_size, hidden), jnp.float32),
        "bu1": s * jax.random.normal(ks[1], (1, hidden), jnp.float32),
        "wu2": s * jax.random.normal(ks[2], (hidden, embedding_size), jnp.float32),
        "bu2": s * jax.random.normal(ks[3], (1, embedding_size), jnp.float32),
        "wi1": s * jax.random.normal(ks[4], (item_input_size, hidden), jnp.float32),
        "bi1": s * jax.random.normal(ks[5], (1, hidden), jnp.float32),
        "wi2": s * jax.random.normal(ks[6], (hidden, embedding_size), jnp.float32),
        "bi2": s * jax.random.normal(ks[7], (1, embedding_size), jnp.float32),
    }


def reference_forward(user_input, item_input, params):
    """Pure-JAX f32 reference matching the PyTorch module's forward."""
    h_u = jnp.maximum(user_input @ params["wu1"] + params["bu1"], 0.0)
    ue = h_u @ params["wu2"] + params["bu2"]
    h_i = jnp.maximum(item_input @ params["wi1"] + params["bi1"], 0.0)
    ie = h_i @ params["wi2"] + params["bi2"]
    return jax.nn.sigmoid(jnp.sum(ue * ie, axis=1))


if __name__ == "__main__":
    key = jax.random.PRNGKey(0)
    k_u, k_i, k_p = jax.random.split(key, 3)

    # 32 users x 16 items -> 512 user-item pairs (as the module's train loop builds them),
    # 16 user features, 12 item features, hidden=128, embedding_size=64.
    B, U_in, I_in, E = 512, 16, 12, 64
    user_input = jax.random.normal(k_u, (B, U_in), jnp.float32)
    item_input = jax.random.normal(k_i, (B, I_in), jnp.float32)
    params = init_params(k_p, U_in, I_in, embedding_size=E)

    # Pack the block-diagonal weights ONCE (hoisted out of the per-call path).
    packed = jax.tree_util.tree_map(jax.block_until_ready, pack_params(params))

    fwd = jax.jit(two_tower_forward, static_argnames=("tb", "num_cores"))
    scores = jax.block_until_ready(fwd(user_input, item_input, packed))

    ref = reference_forward(user_input, item_input, params)
    assert scores.shape == (B,)
    err = jnp.max(jnp.abs(scores - ref))
    # bf16 matmul operands vs the f32 reference -> small absolute slack.
    assert err < 1e-2, f"max abs err {err}"

    print("KERNEL_OK")
</pallas_src>

<mosaic_0001>
module attributes {stable_mosaic.version = 11 : i64} {
  func.func @two_tower_kernel(%arg0: i32, %arg1: memref<29x512xbf16, #tpu.memory_space<vmem>>, %arg2: memref<256x29xbf16, #tpu.memory_space<vmem>>, %arg3: memref<128x256xbf16, #tpu.memory_space<vmem>>, %arg4: memref<128x1xf32, #tpu.memory_space<vmem>>, %arg5: memref<1x512xf32, #tpu.memory_space<vmem>>) attributes {dimension_semantics = [#tpu.dimension_semantics<parallel>], iteration_bounds = array<i64: 1>, scalar_prefetch = 0 : i64, scratch_operands = 0 : i64, tpu.core_type = #tpu.core_type<tc>, window_params = [{transform_indices = @transform_0, window_bounds = array<i64: 29, 512>}, {pipeline_mode = #tpu.pipeline_mode<synchronous>, transform_indices = @transform_1, window_bounds = array<i64: 256, 29>}, {pipeline_mode = #tpu.pipeline_mode<synchronous>, transform_indices = @transform_2, window_bounds = array<i64: 128, 256>}, {pipeline_mode = #tpu.pipeline_mode<synchronous>, transform_indices = @transform_3, window_bounds = array<i64: 128, 1>}, {transform_indices = @transform_4, window_bounds = array<i64: 1, 512>}]} {
    %c0 = arith.constant 0 : index
    %c0_0 = arith.constant 0 : index
    %0 = vector.load %arg2[%c0, %c0_0] : memref<256x29xbf16, #tpu.memory_space<vmem>>, vector<256x29xbf16>
    %c0_1 = arith.constant 0 : index
    %c0_2 = arith.constant 0 : index
    %1 = vector.load %arg1[%c0_1, %c0_2] : memref<29x512xbf16, #tpu.memory_space<vmem>>, vector<29x512xbf16>
    %cst = arith.constant dense<0.000000e+00> : vector<256x512xf32>
    %2 = tpu.matmul %0, %1, %cst {dimension_numbers = #tpu.dot_dimension_numbers<[1], [0], [0], [1], [0, 0, 1, 1], [], []>} : vector<256x29xbf16>, vector<29x512xbf16>, vector<256x512xf32> -> vector<256x512xf32>
    %3 = arith.truncf %2 : vector<256x512xf32> to vector<256x512xbf16>
    %cst_3 = arith.constant 0.000000e+00 : bf16
    %4 = vector.broadcast %cst_3 : bf16 to vector<256x512xbf16>
    %5 = arith.maximumf %3, %4 : vector<256x512xbf16>
    %c0_4 = arith.constant 0 : index
    %c0_5 = arith.constant 0 : index
    %6 = vector.load %arg3[%c0_4, %c0_5] : memref<128x256xbf16, #tpu.memory_space<vmem>>, vector<128x256xbf16>
    %cst_6 = arith.constant dense<0.000000e+00> : vector<128x512xf32>
    %7 = tpu.matmul %6, %5, %cst_6 {dimension_numbers = #tpu.dot_dimension_numbers<[1], [0], [0], [1], [0, 0, 1, 1], [], []>} : vector<128x256xbf16>, vector<256x512xbf16>, vector<128x512xf32> -> vector<128x512xf32>
    %c0_7 = arith.constant 0 : index
    %c0_8 = arith.constant 0 : index
    %8 = vector.load %arg4[%c0_7, %c0_8] : memref<128x1xf32, #tpu.memory_space<vmem>>, vector<128x1xf32>
    %9 = vector.broadcast %8 : vector<128x1xf32> to vector<128x512xf32>
    %10 = arith.addf %7, %9 : vector<128x512xf32>
    %11 = vector.extract_strided_slice %10 {offsets = [0, 0], sizes = [64, 512], strides = [1, 1]} : vector<128x512xf32> to vector<64x512xf32>
    %12 = vector.extract_strided_slice %10 {offsets = [64, 0], sizes = [64, 512], strides = [1, 1]} : vector<128x512xf32> to vector<64x512xf32>
    %13 = arith.mulf %11, %12 : vector<64x512xf32>
    %cst_9 = arith.constant dense<0.000000e+00> : vector<512xf32>
    %14 = vector.multi_reduction <add>, %13, %cst_9 [0] : vector<64x512xf32> to vector<512xf32>
    %15 = vector.shape_cast %14 : vector<512xf32> to vector<1x512xf32>
    %cst_10 = arith.constant 5.000000e-01 : f32
    %16 = vector.broadcast %cst_10 : f32 to vector<1x512xf32>
    %17 = arith.mulf %16, %15 : vector<1x512xf32>
    %18 = math.tanh %17 : vector<1x512xf32>
    %cst_11 = arith.constant 5.000000e-01 : f32
    %19 = vector.broadcast %cst_11 : f32 to vector<1x512xf32>
    %20 = arith.mulf %19, %18 : vector<1x512xf32>
    %cst_12 = arith.constant 5.000000e-01 : f32
    %21 = vector.broadcast %cst_12 : f32 to vector<1x512xf32>
    %22 = arith.addf %20, %21 : vector<1x512xf32>
    %c0_13 = arith.constant 0 : index
    %c0_14 = arith.constant 0 : index
    %23 = vector.load %arg5[%c0_13, %c0_14] : memref<1x512xf32, #tpu.memory_space<vmem>>, vector<1x512xf32>
    tpu.vector_store %arg5[%c0_13, %c0_14], %22 {strides = array<i32>} : memref<1x512xf32, #tpu.memory_space<vmem>>, vector<1x512xf32>,
    return
  }
  func.func @transform_0(%arg0: i32) -> (i32, i32) {
    %c0_i32 = arith.constant 0 : i32
    %c0_i32_0 = arith.constant 0 : i32
    return %c0_i32, %arg0 : i32, i32
  }
  func.func @transform_1(%arg0: i32) -> (i32, i32) {
    %c0_i32 = arith.constant 0 : i32
    %c0_i32_0 = arith.constant 0 : i32
    %c0_i32_1 = arith.constant 0 : i32
    return %c0_i32, %c0_i32_0 : i32, i32
  }
  func.func @transform_2(%arg0: i32) -> (i32, i32) {
    %c0_i32 = arith.constant 0 : i32
    %c0_i32_0 = arith.constant 0 : i32
    %c0_i32_1 = arith.constant 0 : i32
    return %c0_i32, %c0_i32_0 : i32, i32
  }
  func.func @transform_3(%arg0: i32) -> (i32, i32) {
    %c0_i32 = arith.constant 0 : i32
    %c0_i32_0 = arith.constant 0 : i32
    %c0_i32_1 = arith.constant 0 : i32
    return %c0_i32, %c0_i32_0 : i32, i32
  }
  func.func @transform_4(%arg0: i32) -> (i32, i32) {
    %c0_i32 = arith.constant 0 : i32
    %c0_i32_0 = arith.constant 0 : i32
    return %c0_i32, %arg0 : i32, i32
  }
}

</mosaic_0001>

<bundles_post_ra>
// kernel: two_tower_forward.1
= control target key start
LH: loop header
LB: loop body
LE: loop exit
PB: predicated region body
PF: predicated region fallthrough
CT: control target
= control target key end

     0   :  { %vm224_vm0 = vcmask 1045504   ;;  %vm225_vm1 = vcmask 1046528   ;;  %v1480_v1 = vmov 65535   ;;  %v2229_v12 = vmov 0   ;;  %s2224_s0 = inlined_call_operand.vmem [shape: bf16[29,512], index: 0, kind: input, shape index: {}]   ;;  %s2225_s1 = inlined_call_operand.vmem [shape: bf16[256,29], index: 1, kind: input, shape index: {}]   ;;  %s2226_s2 = inlined_call_operand.vmem [shape: bf16[128,256], index: 2, kind: input, shape index: {}]   ;;  %s2227_s3 = inlined_call_operand.vmem [shape: f32[128,1], index: 3, kind: input, shape index: {}]   ;;  %s2228_s4 = inlined_call_operand.hbm [shape: f32[1,512], index: 4, kind: output, shape index: {}]  }
   0x1   :  { %v1398_v0 = vld [vmem:[%s2224_s0 + $0x24] ss:$16 sps:$4 sm:$0x7f]   ;;  %v226_v2 = vsel %vm224_vm0, 4294967295, %v1480_v1  ;;  %v1406_v11 = vld [vmem:[%s2224_s0 + $0xc] ss:$16 sps:$4 sm:$0xff]   ;;  %272 = vmatprep.mubr.bf16.mxu0 %v2229_v12  ;;  %465 = vmatprep.mubr.bf16.mxu1 %v2229_v12 }
   0x2   :  { %v1400_v3 = vld [vmem:[%s2224_s0 + $0x2c] ss:$16 sps:$4 sm:$0x7f]   ;;  %v227_v4 = vsel %vm225_vm1, %v226_v2, 0  ;;  %v1404_v6 = vld [vmem:[%s2224_s0 + $0x4] ss:$16 sps:$4 sm:$0xff]   ;;  %1396 = vset.pattern.permute.xlu0 %v2229_v12  ;;  %1397 = vset.pattern.permute.xlu1 %v2229_v12 }
   0x3   :  { %v1402_v5 = vld [vmem:[%s2224_s0 + $0x20] ss:$16 sps:$4 sm:$0x7f]   ;;  %v232_v7 = vand.u32 %v1398_v0, %v227_v4  ;;  %v238_v8 = vand.u32 %v1400_v3, %v227_v4  ;;  %v1403_v9 = vld [vmem:[%s2224_s0 + $0x28] ss:$16 sps:$4 sm:$0x7f]  }
   0x4   :  { %v229_v10 = vand.u32 %v1402_v5, %v227_v4  ;;  %v235_v13 = vand.u32 %v1403_v9, %v227_v4  ;;  %v1408_v14 = vld [vmem:[%s2224_s0] ss:$16 sps:$4 sm:$0xff]   ;;  %v1409_v15 = vld [vmem:[%s2224_s0 + $0x8] ss:$16 sps:$4 sm:$0xff]   ;;  %vm175_vm2 = vcmask 236544  }
   0x5   :  { %252 = vmatprep.subr.bf16.mxu0 %v232_v7  ;;  %445 = vmatprep.subr.bf16.mxu1 %v238_v8  ;;  %v1410_v16 = vld [vmem:[%s2225_s1] sm:$0xff]   ;;  %v1411_v17 = vld [vmem:[%s2225_s1 + $0x8] sm:$0xff]   ;;  %v1412_v18 = vld [vmem:[%s2225_s1 + $0x10] sm:$0xff]  }
   0x6   :  { %253 = vmatpush1.bf16.msra.mxu0 %v229_v10  ;;  %446 = vmatpush1.bf16.msra.mxu1 %v235_v13 }
   0x7   :  { %254 = vmatprep.subr.bf16.mxu0 %v1404_v6  ;;  %447 = vmatprep.subr.bf16.mxu1 %v1406_v11 }
   0xa   :  { %255 = vmatpush1.bf16.msra.mxu0 %v1408_v14  ;;  %448 = vmatpush1.bf16.msra.mxu1 %v1409_v15 }
   0xd   :  { %1344 = vmatmul.mubr.msk.bf16.vlgmr.msra.gmra.mxu0 %vm175_vm2, %v1410_v16  ;;  %1360 = vmatmul.mubr.msk.bf16.vlgmr.msra.gmra.mxu1 %vm175_vm2, %v1410_v16 }
   0xe   :  { %282 = vmatprep.mubr.bf16.mxu0 %v2229_v12  ;;  %475 = vmatprep.mubr.bf16.mxu1 %v2229_v12 }
  0x15   :  { %1345 = vmatmul.mubr.msk.bf16.gmra.mxu0 %vm175_vm2, %v1411_v17  ;;  %1361 = vmatmul.mubr.msk.bf16.gmra.mxu1 %vm175_vm2, %v1411_v17 }
  0x16   :  { %292 = vmatprep.mubr.bf16.mxu0 %v2229_v12  ;;  %485 = vmatprep.mubr.bf16.mxu1 %v2229_v12 }
  0x17   :  { %9 = vsyncpa [#allocation3], 0  ;;  %v1413_v19 = vld [vmem:[%s2225_s1 + $0x18] sm:$0xff]   ;;  %v1414_v20 = vld [vmem:[%s2225_s1 + $0x20] sm:$0xff]  }
  0x18   :  { %v1415_v21 = vld [vmem:[%s2225_s1 + $0x28] sm:$0xff]   ;;  %v1416_v22 = vld [vmem:[%s2225_s1 + $0x30] sm:$0xff]   ;;  %v1417_v23 = vld [vmem:[%s2225_s1 + $0x38] sm:$0xff]  }
  0x19   :  { %v1418_v24 = vld [vmem:[%s2225_s1 + $0x40] sm:$0xff]   ;;  %v1419_v25 = vld [vmem:[%s2225_s1 + $0x48] sm:$0xff]   ;;  %v1420_v26 = vld [vmem:[%s2225_s1 + $0x50] sm:$0xff]  }
  0x1a   :  { %v1421_v27 = vld [vmem:[%s2225_s1 + $0x58] sm:$0xff]   ;;  %v1422_v28 = vld [vmem:[%s2225_s1 + $0x60] sm:$0xff]   ;;  %v1423_v29 = vld [vmem:[%s2225_s1 + $0x68] sm:$0xff]  }
  0x1b   :  { %v1424_v30 = vld [vmem:[%s2225_s1 + $0x70] sm:$0xff]   ;;  %v1425_v31 = vld [vmem:[%s2225_s1 + $0x78] sm:$0xff]   ;;  %v1428_v10 = vld [vmem:[%s2226_s2 + $0x4] ss:$8 sps:$4 sm:$0xff]  }
  0x1d   :  { %1346 = vmatmul.mubr.msk.bf16.gmra.mxu0 %vm175_vm2, %v1412_v18  ;;  %1362 = vmatmul.mubr.msk.bf16.gmra.mxu1 %vm175_vm2, %v1412_v18 }
  0x1e   :  { %302 = vmatprep.mubr.bf16.mxu0 %v2229_v12  ;;  %495 = vmatprep.mubr.bf16.mxu1 %v2229_v12 }
  0x25   :  { %1347 = vmatmul.mubr.msk.bf16.gmra.mxu0 %vm175_vm2, %v1413_v19  ;;  %1363 = vmatmul.mubr.msk.bf16.gmra.mxu1 %vm175_vm2, %v1413_v19 }
  0x26   :  { %312 = vmatprep.mubr.bf16.mxu0 %v2229_v12  ;;  %505 = vmatprep.mubr.bf16.mxu1 %v2229_v12 }
  0x2d   :  { %1348 = vmatmul.mubr.msk.bf16.gmra.mxu0 %vm175_vm2, %v1414_v20  ;;  %1364 = vmatmul.mubr.msk.bf16.gmra.mxu1 %vm175_vm2, %v1414_v20 }
  0x2e   :  { %322 = vmatprep.mubr.bf16.mxu0 %v2229_v12  ;;  %515 = vmatprep.mubr.bf16.mxu1 %v2229_v12 }
  0x35   :  { %1349 = vmatmul.mubr.msk.bf16.gmra.mxu0 %vm175_vm2, %v1415_v21  ;;  %1365 = vmatmul.mubr.msk.bf16.gmra.mxu1 %vm175_vm2, %v1415_v21 }
  0x36   :  { %332 = vmatprep.mubr.bf16.mxu0 %v2229_v12  ;;  %525 = vmatprep.mubr.bf16.mxu1 %v2229_v12 }
  0x3d   :  { %1350 = vmatmul.mubr.msk.bf16.gmra.mxu0 %vm175_vm2, %v1416_v22  ;;  %1366 = vmatmul.mubr.msk.bf16.gmra.mxu1 %vm175_vm2, %v1416_v22 }
  0x3e   :  { %342 = vmatprep.mubr.bf16.mxu0 %v2229_v12  ;;  %535 = vmatprep.mubr.bf16.mxu1 %v2229_v12 }
  0x45   :  { %1351 = vmatmul.mubr.msk.bf16.gmra.mxu0 %vm175_vm2, %v1417_v23  ;;  %1367 = vmatmul.mubr.msk.bf16.gmra.mxu1 %vm175_vm2, %v1417_v23 }
  0x46   :  { %352 = vmatprep.mubr.bf16.mxu0 %v2229_v12  ;;  %545 = vmatprep.mubr.bf16.mxu1 %v2229_v12 }
  0x4d   :  { %1352 = vmatmul.mubr.msk.bf16.gmra.mxu0 %vm175_vm2, %v1418_v24  ;;  %1368 = vmatmul.mubr.msk.bf16.gmra.mxu1 %vm175_vm2, %v1418_v24 }
  0x4e   :  { %362 = vmatprep.mubr.bf16.mxu0 %v2229_v12  ;;  %555 = vmatprep.mubr.bf16.mxu1 %v2229_v12 }
  0x55   :  { %1353 = vmatmul.mubr.msk.bf16.gmra.mxu0 %vm175_vm2, %v1419_v25  ;;  %1369 = vmatmul.mubr.msk.bf16.gmra.mxu1 %vm175_vm2, %v1419_v25 }
  0x56   :  { %372 = vmatprep.mubr.bf16.mxu0 %v2229_v12  ;;  %565 = vmatprep.mubr.bf16.mxu1 %v2229_v12 }
  0x5d   :  { %1354 = vmatmul.mubr.msk.bf16.gmra.mxu0 %vm175_vm2, %v1420_v26  ;;  %1370 = vmatmul.mubr.msk.bf16.gmra.mxu1 %vm175_vm2, %v1420_v26 }
  0x5e   :  { %382 = vmatprep.mubr.bf16.mxu0 %v2229_v12  ;;  %575 = vmatprep.mubr.bf16.mxu1 %v2229_v12 }
  0x65   :  { %1355 = vmatmul.mubr.msk.bf16.gmra.mxu0 %vm175_vm2, %v1421_v27  ;;  %1371 = vmatmul.mubr.msk.bf16.gmra.mxu1 %vm175_vm2, %v1421_v27 }
  0x66   :  { %392 = vmatprep.mubr.bf16.mxu0 %v2229_v12  ;;  %585 = vmatprep.mubr.bf16.mxu1 %v2229_v12 }
  0x6d   :  { %1356 = vmatmul.mubr.msk.bf16.gmra.mxu0 %vm175_vm2, %v1422_v28  ;;  %1372 = vmatmul.mubr.msk.bf16.gmra.mxu1 %vm175_vm2, %v1422_v28 }
  0x6e   :  { %402 = vmatprep.mubr.bf16.mxu0 %v2229_v12  ;;  %595 = vmatprep.mubr.bf16.mxu1 %v2229_v12 }
  0x75   :  { %1357 = vmatmul.mubr.msk.bf16.gmra.mxu0 %vm175_vm2, %v1423_v29  ;;  %1373 = vmatmul.mubr.msk.bf16.gmra.mxu1 %vm175_vm2, %v1423_v29 }
  0x76   :  { %412 = vmatprep.mubr.bf16.mxu0 %v2229_v12  ;;  %605 = vmatprep.mubr.bf16.mxu1 %v2229_v12 }
  0x7d   :  { %1358 = vmatmul.mubr.msk.bf16.gmra.mxu0 %vm175_vm2, %v1424_v30  ;;  %1374 = vmatmul.mubr.msk.bf16.gmra.mxu1 %vm175_vm2, %v1424_v30 }
  0x7e   :  { %422 = vmatprep.mubr.bf16.mxu0 %v2229_v12  ;;  %615 = vmatprep.mubr.bf16.mxu1 %v2229_v12 }
  0x85   :  { %1359 = vmatmul.mubr.msk.bf16.gmra.mxu0 %vm175_vm2, %v1425_v31  ;;  %1375 = vmatmul.mubr.msk.bf16.gmra.mxu1 %vm175_vm2, %v1425_v31 }
  0x86   :  { %978 = vmatprep.mubr.bf16.mxu0 %v1428_v10  ;;  %1091 = vmatprep.mubr.bf16.mxu1 %v1428_v10 }
  0xcd   :  { %v1647_v32 = vpop.f32.mrf.mxu0  ;;  %v1649_v33 = vpop.f32.mrf.mxu1 }
  0xce   :  { %2259 = vst [vmem:[#allocation5_spill] sm:$0xff] %v1647_v32  ;;  %2260 = vst [vmem:[#allocation6_spill] sm:$0xff] %v1649_v33 }
  0xcf   :  { %v1651_v34 = vpop.f32.mrf.mxu0  ;;  %v1653_v35 = vpop.f32.mrf.mxu1 }
  0xd0   :  { %2261 = vst [vmem:[#allocation7_spill] sm:$0xff] %v1651_v34  ;;  %2262 = vst [vmem:[#allocation8_spill] sm:$0xff] %v1653_v35 }
  0xd1   :  { %v1655_v36 = vpop.f32.mrf.mxu0  ;;  %v1659_v38 = vpop.f32.mrf.mxu1 }
  0xd2   :  { %2263 = vst [vmem:[#allocation9_spill] sm:$0xff] %v1655_v36  ;;  %2264 = vst [vmem:[#allocation10_spill] sm:$0xff] %v1659_v38 }
  0xd3   :  { %v1663_v40 = vpop.f32.mrf.mxu0  ;;  %v1667_v42 = vpop.f32.mrf.mxu1 }
  0xd4   :  { %2265 = vst [vmem:[#allocation11_spill] sm:$0xff] %v1663_v40  ;;  %2266 = vst [vmem:[#allocation12_spill] sm:$0xff] %v1667_v42 }
  0xd5   :  { %v1671_v44 = vpop.f32.mrf.mxu0  ;;  %v1673_v45 = vpop.f32.mrf.mxu1 }
  0xd6   :  { %2267 = vst [vmem:[#allocation13_spill] sm:$0xff] %v1671_v44  ;;  %2268 = vst [vmem:[#allocation14_spill] sm:$0xff] %v1673_v45 }
  0xd7   :  { %v1675_v46 = vpop.f32.mrf.mxu0  ;;  %v1677_v47 = vpop.f32.mrf.mxu1 }
  0xd8   :  { %2269 = vst [vmem:[#allocation15_spill] sm:$0xff] %v1677_v47 }
  0xd9   :  { %v1679_v48 = vpop.f32.mrf.mxu0  ;;  %v1683_v50 = vpop.f32.mrf.mxu1 }
  0xda   :  { %2270 = vst [vmem:[#allocation16_spill] sm:$0xff] %v1679_v48  ;;  %2271 = vst [vmem:[#allocation17_spill] sm:$0xff] %v1683_v50  ;;  %v2274_v50 = vmov 0  }
  0xdb   :  { %v1687_v52 = vpop.f32.mrf.mxu0  ;;  %v1691_v54 = vpop.f32.mrf.mxu1 }
  0xdc   :  { %2272 = vst [vmem:[#allocation18_spill] sm:$0xff] %v1691_v54 }
  0xdd   :  { %v1695_v56 = vpop.f32.mrf.mxu0  ;;  %v1697_v57 = vpop.f32.mrf.mxu1 }
  0xdf   :  { %v1699_v58 = vpop.f32.mrf.mxu0  ;;  %v1701_v59 = vpop.f32.mrf.mxu1 }
  0xe1   :  { %v1703_v60 = vpop.f32.mrf.mxu0  ;;  %v1705_v61 = vpop.f32.mrf.mxu1 }
  0xe3   :  { %v1707_v62 = vpop.f32.mrf.mxu0  ;;  %v1709_v63 = vpop.f32.mrf.mxu1 }
  0xe5   :  { %v1711_v0 = vpop.f32.mrf.mxu0  ;;  %v1713_v1 = vpop.f32.mrf.mxu1 }
  0xe7   :  { %v1715_v2 = vpop.f32.mrf.mxu0  ;;  %v1717_v3 = vpop.f32.mrf.mxu1 }
  0xe9   :  { %v1719_v4 = vpop.f32.mrf.mxu0  ;;  %v1721_v5 = vpop.f32.mrf.mxu1 }
  0xeb   :  { %v1723_v6 = vpop.f32.mrf.mxu0  ;;  %v1725_v7 = vpop.f32.mrf.mxu1 }
  0xed   :  { %v1727_v8 = vpop.f32.mrf.mxu0  ;;  %v1729_v9 = vpop.f32.mrf.mxu1 }
  0xef   :  { %v1734_v11 = vpop.f32.mrf.mxu0  ;;  %v1736_v13 = vpop.f32.mrf.mxu1 }
  0xf1   :  { %v1738_v14 = vpop.f32.mrf.mxu0  ;;  %v1740_v15 = vpop.f32.mrf.mxu1 }
  0xf3   :  { %v1742_v16 = vpop.f32.mrf.mxu0  ;;  %v1744_v17 = vpop.f32.mrf.mxu1 }
  0xf5   :  { %v1746_v18 = vpop.f32.mrf.mxu0  ;;  %v1748_v19 = vpop.f32.mrf.mxu1 }
  0xf7   :  { %v326_v20 = vpop.f32.mrf.mxu0  ;;  %v519_v21 = vpop.f32.mrf.mxu1 }
  0xf9   :  { %v1750_v22 = vpop.f32.mrf.mxu0  ;;  %v1752_v23 = vpop.f32.mrf.mxu1 }
  0xfb   :  { %v330_v24 = vpop.f32.mrf.mxu0  ;;  %v523_v25 = vpop.f32.mrf.mxu1 }
  0xfd   :  { %v334_v26 = vpop.f32.mrf.mxu0  ;;  %v527_v27 = vpop.f32.mrf.mxu1 }
  0xff   :  { %v336_v28 = vpop.f32.mrf.mxu0  ;;  %v529_v29 = vpop.f32.mrf.mxu1 }
 0x101   :  { %v338_v30 = vpop.f32.mrf.mxu0  ;;  %v531_v31 = vpop.f32.mrf.mxu1 }
 0x102   :  { %v650_v44 = vpack.c.bf16 %v338_v30, %v334_v26  ;;  %v640_v30 = vpack.c.bf16 %v1721_v5, %v1713_v1  ;;  %v634_v5 = vpack.c.bf16 %v1703_v60, %v1695_v56 }
 0x103   :  { %v340_v10 = vpop.f32.mrf.mxu0  ;;  %v533_v39 = vpop.f32.mrf.mxu1 }
 0x104   :  { %v651_v33 = vpack.c.bf16 %v340_v10, %v336_v28  ;;  %v653_v35 = vpack.c.bf16 %v533_v39, %v529_v29  ;;  %v698_v60 = vmax.bf16 %v2274_v50, %v634_v5  ;;  %v2302_v5 = vld [vmem:[#allocation8_spill] sm:$0xff] }
 0x105   :  { %v344_v37 = vpop.f32.mrf.mxu0  ;;  %v537_v43 = vpop.f32.mrf.mxu1 }
 0x107   :  { %v346_v51 = vpop.f32.mrf.mxu0  ;;  %v539_v41 = vpop.f32.mrf.mxu1 }
 0x109   :  { %v348_v49 = vpop.f32.mrf.mxu0  ;;  %v541_v55 = vpop.f32.mrf.mxu1 }
 0x10a   :  { %v654_v53 = vpack.c.bf16 %v348_v49, %v344_v37  ;;  %v656_v38 = vpack.c.bf16 %v541_v55, %v537_v43  ;;  %v647_v37 = vpack.c.bf16 %v330_v24, %v326_v20  ;;  %v652_v49 = vpack.c.bf16 %v531_v31, %v527_v27 }
 0x10b   :  { %v350_v12 = vpop.f32.mrf.mxu0  ;;  %v543_v36 = vpop.f32.mrf.mxu1 }
 0x10c   :  { %v655_v32 = vpack.c.bf16 %v350_v12, %v346_v51  ;;  %v657_v42 = vpack.c.bf16 %v543_v36, %v539_v41  ;;  %v718_v48 = vmax.bf16 %v2274_v50, %v654_v53  ;;  %v715_v12 = vmax.bf16 %v2274_v50, %v651_v33 }
 0x10d   :  { %v1754_v45 = vpop.f32.mrf.mxu0  ;;  %v1757_v40 = vpop.f32.mrf.mxu1  ;;  %v720_v39 = vmax.bf16 %v2274_v50, %v656_v38  ;;  %v649_v41 = vpack.c.bf16 %v523_v25, %v519_v21  ;;  %v643_v33 = vpack.c.bf16 %v1742_v16, %v1734_v11  ;;  %v714_v38 = vmax.bf16 %v2274_v50, %v650_v44 }
 0x10e   :  { %2273 = vst [vmem:[#allocation19_spill] sm:$0xff] %v1754_v45  ;;  %v719_v34 = vmax.bf16 %v2274_v50, %v655_v32  ;;  %2275 = vst [vmem:[#allocation20_spill] sm:$0xff] %v1757_v40  ;;  %v721_v47 = vmax.bf16 %v2274_v50, %v657_v42  ;;  %v717_v32 = vmax.bf16 %v2274_v50, %v653_v35 }
 0x10f   :  { %v1761_v54 = vpop.f32.mrf.mxu0  ;;  %v1765_v36 = vpop.f32.mrf.mxu1  ;;  %v711_v53 = vmax.bf16 %v2274_v50, %v647_v37  ;;  %v716_v55 = vmax.bf16 %v2274_v50, %v652_v49  ;;  %v645_v44 = vpack.c.bf16 %v1744_v17, %v1736_v13  ;;  %v639_v13 = vpack.c.bf16 %v1723_v6, %v1715_v2 }
 0x110   :  { %2276 = vst [vmem:[#allocation21_spill] sm:$0xff] %v1761_v54  ;;  %2277 = vst [vmem:[#allocation22_spill] sm:$0xff] %v1765_v36  ;;  %946 = vmatprep.subr.bf16.mxu0 %v719_v34  ;;  %1059 = vmatprep.subr.bf16.mxu1 %v721_v47  ;;  %v646_v34 = vpack.c.bf16 %v1750_v22, %v1746_v18  ;;  %v713_v18 = vmax.bf16 %v2274_v50, %v649_v41 }
 0x111   :  { %v1768_v43 = vpop.f32.mrf.mxu0  ;;  %947 = vmatpush1.bf16.msra.mxu0 %v718_v48  ;;  %v1772_v51 = vpop.f32.mrf.mxu1  ;;  %1060 = vmatpush1.bf16.msra.mxu1 %v720_v39  ;;  %v648_v48 = vpack.c.bf16 %v1752_v23, %v1748_v19  ;;  %v642_v22 = vpack.c.bf16 %v1738_v14, %v1727_v8  ;;  %v644_v17 = vpack.c.bf16 %v1740_v15, %v1729_v9 }
 0x112   :  { %2278 = vst [vmem:[#allocation23_spill] sm:$0xff] %v1768_v43  ;;  %2279 = vst [vmem:[#allocation24_spill] sm:$0xff] %v1772_v51  ;;  %948 = vmatprep.subr.bf16.mxu0 %v715_v12  ;;  %1061 = vmatprep.subr.bf16.mxu1 %v717_v32  ;;  %v710_v23 = vmax.bf16 %v2274_v50, %v646_v34  ;;  %v707_v25 = vmax.bf16 %v2274_v50, %v643_v33 }
 0x113   :  { %v1781_v47 = vpop.f32.mrf.mxu0  ;;  %v1789_v16 = vpop.f32.mrf.mxu1  ;;  %v712_v26 = vmax.bf16 %v2274_v50, %v648_v48  ;;  %v641_v8 = vpack.c.bf16 %v1725_v7, %v1717_v3  ;;  %v709_v14 = vmax.bf16 %v2274_v50, %v645_v44  ;;  %v635_v9 = vpack.c.bf16 %v1707_v62, %v1699_v58  ;;  %v2290_v44 = vld [vmem:[#allocation15_spill] sm:$0xff] }
 0x114   :  { %2280 = vst [vmem:[#allocation25_spill] sm:$0xff] %v1781_v47  ;;  %2281 = vst [vmem:[#allocation26_spill] sm:$0xff] %v1789_v16  ;;  %v638_v15 = vpack.c.bf16 %v1719_v4, %v1711_v0  ;;  %v706_v3 = vmax.bf16 %v2274_v50, %v642_v22  ;;  %v703_v31 = vmax.bf16 %v2274_v50, %v639_v13 }
 0x115   :  { %v1796_v21 = vpop.f32.mrf.mxu0  ;;  %949 = vmatpush1.bf16.msra.mxu0 %v714_v38  ;;  %v1798_v19 = vpop.f32.mrf.mxu1  ;;  %1062 = vmatpush1.bf16.msra.mxu1 %v716_v55  ;;  %v708_v10 = vmax.bf16 %v2274_v50, %v644_v17  ;;  %v637_v0 = vpack.c.bf16 %v1709_v63, %v1701_v59  ;;  %v705_v4 = vmax.bf16 %v2274_v50, %v641_v8  ;;  %v2289_v55 = vld [vmem:[#allocation18_spill] sm:$0xff]  ;;  %v2292_v17 = vld [vmem:[#allocation16_spill] sm:$0xff]  ;;  %v2295_v8 = vld [vmem:[#allocation11_spill] sm:$0xff] }
 0x116   :  { %2282 = vst [vmem:[#allocation27_spill] sm:$0xff] %v1796_v21  ;;  %2283 = vst [vmem:[#allocation28_spill] sm:$0xff] %v1798_v19  ;;  %950 = vmatprep.subr.bf16.mxu0 %v711_v53  ;;  %1063 = vmatprep.subr.bf16.mxu1 %v713_v18  ;;  %v702_v12 = vmax.bf16 %v2274_v50, %v638_v15  ;;  %v636_v59 = vpack.c.bf16 %v1705_v61, %v1697_v57 }
 0x117   :  { %v1803_v24 = vpop.f32.mrf.mxu0  ;;  %v1811_v27 = vpop.f32.mrf.mxu1  ;;  %v699_v63 = vmax.bf16 %v2274_v50, %v635_v9  ;;  %v704_v41 = vmax.bf16 %v2274_v50, %v640_v30  ;;  %v701_v33 = vmax.bf16 %v2274_v50, %v637_v0  ;;  %v2288_v57 = vpack.c.bf16 %v1687_v52, %v1675_v46  ;;  %v2293_v46 = vld [vmem:[#allocation13_spill] sm:$0xff]  ;;  %v2299_v30 = vld [vmem:[#allocation14_spill] sm:$0xff] }
 0x118   :  { %2284 = vst [vmem:[#allocation29_spill] sm:$0xff] %v1811_v27  ;;  %v700_v48 = vmax.bf16 %v2274_v50, %v636_v59  ;;  %v2291_v18 = vpack.c.bf16 %v2289_v55, %v2290_v44  ;;  %v2294_v52 = vpack.c.bf16 %v2292_v17, %v2293_v46 }
 0x119   :  { %v1816_v28 = vpop.f32.mrf.mxu0  ;;  %951 = vmatpush1.bf16.msra.mxu0 %v710_v23  ;;  %v1820_v6 = vpop.f32.mrf.mxu1  ;;  %1064 = vmatpush1.bf16.msra.mxu1 %v712_v26  ;;  %v695_v61 = vmax.bf16 %v2274_v50, %v2288_v57  ;;  %v2304_v57 = vld [vmem:[#allocation9_spill] sm:$0xff] }
 0x11a   :  { %2285 = vst [vmem:[#allocation30_spill] sm:$0xff] %v1816_v28  ;;  %2286 = vst [vmem:[#allocation31_spill] sm:$0xff] %v1820_v6  ;;  %952 = vmatprep.subr.bf16.mxu0 %v707_v25  ;;  %1065 = vmatprep.subr.bf16.mxu1 %v709_v14  ;;  %v697_v22 = vmax.bf16 %v2274_v50, %v2291_v18  ;;  %v694_v25 = vmax.bf16 %v2274_v50, %v2294_v52  ;;  %v2296_v14 = vld [vmem:[#allocation7_spill] sm:$0xff]  ;;  %v2307_v18 = vld [vmem:[#allocation10_spill] sm:$0xff] }
 0x11b   :  { %v1829_v29 = vpop.f32.mrf.mxu0  ;;  %v1837_v62 = vpop.f32.mrf.mxu1  ;;  %v2297_v9 = vpack.c.bf16 %v2295_v8, %v2296_v14  ;;  %v779_v14 = vld [vmem:[%s2227_s3 + $0x48] sm:$0xff] }
 0x11c   :  { %2287 = vst [vmem:[#allocation32_spill] sm:$0xff] %v1837_v62 }
 0x11d   :  { %v1844_v49 = vpop.f32.mrf.mxu0  ;;  %953 = vmatpush1.bf16.msra.mxu0 %v706_v3  ;;  %v1846_v1 = vpop.f32.mrf.mxu1  ;;  %1066 = vmatpush1.bf16.msra.mxu1 %v708_v10  ;;  %v691_v15 = vmax.bf16 %v2274_v50, %v2297_v9  ;;  %v2298_v3 = vld [vmem:[#allocation17_spill] sm:$0xff] }
 0x11e   :  { %954 = vmatprep.subr.bf16.mxu0 %v703_v31  ;;  %1067 = vmatprep.subr.bf16.mxu1 %v705_v4  ;;  %v2300_v31 = vpack.c.bf16 %v2298_v3, %v2299_v30  ;;  %v2301_v4 = vld [vmem:[#allocation12_spill] sm:$0xff]  ;;  %v772_v30 = vld [vmem:[%s2227_s3 + $0x10] sm:$0xff] }
 0x11f   :  { %v1851_v39 = vpop.f32.mrf.mxu0  ;;  %v1857_v32 = vpop.f32.mrf.mxu1 }
 0x120   :  { %v696_v10 = vmax.bf16 %v2274_v50, %v2300_v31 }
 0x121   :  { %v1860_v34 = vpop.f32.mrf.mxu0  ;;  %955 = vmatpush1.bf16.msra.mxu0 %v702_v12  ;;  %v1862_v56 = vpop.f32.mrf.mxu1  ;;  %1068 = vmatpush1.bf16.msra.mxu1 %v704_v41  ;;  %v2303_v12 = vpack.c.bf16 %v2301_v4, %v2302_v5  ;;  %v770_v41 = vld [vmem:[%s2227_s3] sm:$0xff] }
 0x122   :  { %956 = vmatprep.subr.bf16.mxu0 %v699_v63  ;;  %1069 = vmatprep.subr.bf16.mxu1 %v701_v33  ;;  %v778_v33 = vld [vmem:[%s2227_s3 + $0x40] sm:$0xff] }
 0x123   :  { %v1865_v38 = vpop.f32.mrf.mxu0  ;;  %v1872_v53 = vpop.f32.mrf.mxu1  ;;  %v693_v59 = vmax.bf16 %v2274_v50, %v2303_v12  ;;  %788 = vperm.xlu0 %1396, %v770_v41   ;;  %828 = vperm.xlu1 %1397, %v778_v33   ;;  %v781_v33 = vld [vmem:[%s2227_s3 + $0x58] sm:$0xff] }
 0x125   :  { %v1878_v23 = vpop.f32.mrf.mxu0  ;;  %957 = vmatpush1.bf16.msra.mxu0 %v698_v60  ;;  %v1880_v13 = vpop.f32.mrf.mxu1  ;;  %1070 = vmatpush1.bf16.msra.mxu1 %v700_v48 }
 0x126   :  { %958 = vmatprep.subr.bf16.mxu0 %v695_v61  ;;  %1071 = vmatprep.subr.bf16.mxu1 %v697_v22  ;;  %v2305_v61 = vld [vmem:[#allocation5_spill] sm:$0xff]  ;;  %v2308_v22 = vld [vmem:[#allocation6_spill] sm:$0xff] }
 0x127   :  { %v1886_v26 = vpop.f32.mrf.mxu0  ;;  %v1896_v0 = vpop.f32.mrf.mxu1  ;;  %v2306_v48 = vpack.c.bf16 %v2304_v57, %v2305_v61  ;;  %v2309_v17 = vpack.c.bf16 %v2307_v18, %v2308_v22  ;;  %833 = vperm.xlu1 %1397, %v779_v14   ;;  %v782_v22 = vld [vmem:[%s2227_s3 + $0x60] sm:$0xff]  ;;  %v775_v14 = vld [vmem:[%s2227_s3 + $0x28] sm:$0xff] }
 0x129   :  { %v1902_v63 = vpop.f32.mrf.mxu0  ;;  %959 = vmatpush1.bf16.msra.mxu0 %v694_v25  ;;  %v1910_v60 = vpop.f32.mrf.mxu1  ;;  %1072 = vmatpush1.bf16.msra.mxu1 %v696_v10  ;;  %v690_v55 = vmax.bf16 %v2274_v50, %v2306_v48  ;;  %v692_v46 = vmax.bf16 %v2274_v50, %v2309_v17  ;;  %v771_v25 = vld [vmem:[%s2227_s3 + $0x8] sm:$0xff]  ;;  %v780_v10 = vld [vmem:[%s2227_s3 + $0x50] sm:$0xff] }
 0x12a   :  { %960 = vmatprep.subr.bf16.mxu0 %v691_v15  ;;  %1073 = vmatprep.subr.bf16.mxu1 %v693_v59  ;;  %v773_v59 = vld [vmem:[%s2227_s3 + $0x18] sm:$0xff] }
 0x12b   :  { %v1916_v44 = vpop.f32.mrf.mxu0  ;;  %v1922_v52 = vpop.f32.mrf.mxu1  ;;  %793 = vperm.xlu0 %1396, %v771_v25   ;;  %838 = vperm.xlu1 %1397, %v780_v10   ;;  %v783_v10 = vld [vmem:[%s2227_s3 + $0x68] sm:$0xff] }
 0x12d   :  { %v1927_v8 = vpop.f32.mrf.mxu0  ;;  %961 = vmatpush1.bf16.msra.mxu0 %v690_v55  ;;  %v1932_v9 = vpop.f32.mrf.mxu1  ;;  %1074 = vmatpush1.bf16.msra.mxu1 %v692_v46  ;;  %v774_v55 = vld [vmem:[%s2227_s3 + $0x20] sm:$0xff] }
 0x12f   :  { %v1934_v15 = vpop.f32.mrf.mxu0  ;;  %v1936_v3 = vpop.f32.mrf.mxu1  ;;  %798 = vperm.xlu0 %1396, %v772_v30   ;;  %843 = vperm.xlu1 %1397, %v781_v33  }
 0x131   :  { %v1941_v31 = vpop.f32.mrf.mxu0  ;;  %v1946_v4 = vpop.f32.mrf.mxu1 }
 0x133   :  { %v1948_v5 = vpop.f32.mrf.mxu0  ;;  %v1950_v12 = vpop.f32.mrf.mxu1  ;;  %803 = vperm.xlu0 %1396, %v773_v59   ;;  %848 = vperm.xlu1 %1397, %v782_v22   ;;  %v784_v22 = vld [vmem:[%s2227_s3 + $0x70] sm:$0xff] }
 0x135   :  { %v1955_v41 = vpop.f32.mrf.mxu0  ;;  %v1960_v57 = vpop.f32.mrf.mxu1 }
 0x137   :  { %v1962_v61 = vpop.f32.mrf.mxu0  ;;  %v1964_v48 = vpop.f32.mrf.mxu1  ;;  %808 = vperm.xlu0 %1396, %v774_v55   ;;  %853 = vperm.xlu1 %1397, %v783_v10   ;;  %v776_v55 = vld [vmem:[%s2227_s3 + $0x30] sm:$0xff]  ;;  %v785_v10 = vld [vmem:[%s2227_s3 + $0x78] sm:$0xff] }
 0x139   :  { %v1969_v18 = vpop.f32.mrf.mxu0  ;;  %v1974_v17 = vpop.f32.mrf.mxu1 }
 0x13b   :  { %v410_v46 = vpop.f32.mrf.mxu0  ;;  %v603_v25 = vpop.f32.mrf.mxu1  ;;  %813 = vperm.xlu0 %1396, %v775_v14   ;;  %858 = vperm.xlu1 %1397, %v784_v22   ;;  %v777_v14 = vld [vmem:[%s2227_s3 + $0x38] sm:$0xff] }
 0x13d   :  { %v414_v30 = vpop.f32.mrf.mxu0  ;;  %v607_v59 = vpop.f32.mrf.mxu1 }
 0x13f   :  { %v416_v33 = vpop.f32.mrf.mxu0  ;;  %v609_v35 = vpop.f32.mrf.mxu1  ;;  %818 = vperm.xlu0 %1396, %v776_v55   ;;  %863 = vperm.xlu1 %1397, %v785_v10  }
 0x141   :  { %v418_v42 = vpop.f32.mrf.mxu0  ;;  %v611_v20 = vpop.f32.mrf.mxu1 }
 0x142   :  { %v682_v21 = vpack.c.bf16 %v418_v42, %v414_v30  ;;  %v684_v10 = vpack.c.bf16 %v611_v20, %v607_v59  ;;  %v674_v20 = vpack.c.bf16 %v1941_v31, %v1927_v8  ;;  %v2315_v31 = vld [vmem:[#allocation27_spill] sm:$0xff] }
 0x143   :  { %v420_v7 = vpop.f32.mrf.mxu0  ;;  %v613_v11 = vpop.f32.mrf.mxu1  ;;  %823 = vperm.xlu0 %1396, %v777_v14   ;;  %v679_v14 = vpack.c.bf16 %v410_v46, %v1962_v61  ;;  %v2321_v61 = vld [vmem:[#allocation28_spill] sm:$0xff]  ;;  %v2324_v46 = vld [vmem:[#allocation22_spill] sm:$0xff]  ;;  %v2326_v59 = vld [vmem:[#allocation23_spill] sm:$0xff] }
 0x144   :  { %v683_v36 = vpack.c.bf16 %v420_v7, %v416_v33  ;;  %v685_v6 = vpack.c.bf16 %v613_v11, %v609_v35  ;;  %v677_v11 = vpack.c.bf16 %v1950_v12, %v1936_v3  ;;  %v2314_v3 = vld [vmem:[#allocation30_spill] sm:$0xff]  ;;  %v2317_v12 = vld [vmem:[#allocation25_spill] sm:$0xff]  ;;  %v2327_v33 = vld [vmem:[#allocation19_spill] sm:$0xff] }
 0x145   :  { %v424_v2 = vpop.f32.mrf.mxu0  ;;  %v617_v37 = vpop.f32.mrf.mxu1  ;;  %v743_v42 = vmax.bf16 %v2274_v50, %v679_v14  ;;  %v2329_v14 = vld [vmem:[#allocation24_spill] sm:$0xff] }
 0x146   :  { %v747_v62 = vmax.bf16 %v2274_v50, %v683_v36  ;;  %v749_v35 = vmax.bf16 %v2274_v50, %v685_v6  ;;  %v675_v36 = vpack.c.bf16 %v1948_v5, %v1934_v15  ;;  %v673_v6 = vpack.c.bf16 %v1922_v52, %v1896_v0 }
 0x147   :  { %v426_v58 = vpop.f32.mrf.mxu0  ;;  %v619_v40 = vpop.f32.mrf.mxu1  ;;  %v741_v7 = vmax.bf16 %v2274_v50, %v677_v11  ;;  %v669_v52 = vpack.c.bf16 %v1872_v53, %v1857_v32  ;;  %v1440_v11 = vld [vmem:[%s2226_s2 + $0x40] ss:$8 sps:$4 sm:$0xff]  }
 0x148   :  { %v737_v8 = vmax.bf16 %v2274_v50, %v673_v6 }
 0x149   :  { %v428_v51 = vpop.f32.mrf.mxu0  ;;  %v621_v45 = vpop.f32.mrf.mxu1  ;;  %v733_v32 = vmax.bf16 %v2274_v50, %v669_v52 }
 0x14a   :  { %v686_v43 = vpack.c.bf16 %v428_v51, %v424_v2  ;;  %v688_v22 = vpack.c.bf16 %v621_v45, %v617_v37  ;;  %v681_v45 = vpack.c.bf16 %v603_v25, %v1964_v48  ;;  %v667_v37 = vpack.c.bf16 %v1865_v38, %v1851_v39 }
 0x14b   :  { %v430_v55 = vpop.f32.mrf.mxu0  ;;  %v623_v19 = vpop.f32.mrf.mxu1  ;;  %v668_v38 = vpack.c.bf16 %v1862_v56, %v1846_v1  ;;  %v2311_v1 = vld [vmem:[#allocation32_spill] sm:$0xff]  ;;  %v2312_v56 = vld [vmem:[#allocation29_spill] sm:$0xff] }
 0x14c   :  { %v687_v16 = vpack.c.bf16 %v430_v55, %v426_v58  ;;  %v689_v54 = vpack.c.bf16 %v623_v19, %v619_v40  ;;  %v750_v28 = vmax.bf16 %v2274_v50, %v686_v43  ;;  %v752_v51 = vmax.bf16 %v2274_v50, %v688_v22 }
 0x14d   :  { %v678_v40 = vpack.c.bf16 %v1969_v18, %v1955_v41  ;;  %v680_v43 = vpack.c.bf16 %v1974_v17, %v1960_v57  ;;  %v671_v19 = vpack.c.bf16 %v1916_v44, %v1886_v26  ;;  %v670_v58 = vpack.c.bf16 %v1902_v63, %v1878_v23  ;;  %v2320_v57 = vld [vmem:[#allocation31_spill] sm:$0xff]  ;;  %v2323_v17 = vld [vmem:[#allocation26_spill] sm:$0xff] }
 0x14e   :  { %v751_v47 = vmax.bf16 %v2274_v50, %v687_v16  ;;  %v753_v27 = vmax.bf16 %v2274_v50, %v689_v54  ;;  %v746_v54 = vmax.bf16 %v2274_v50, %v682_v21  ;;  %v745_v16 = vmax.bf16 %v2274_v50, %v681_v45 }
 0x14f   :  { %v742_v21 = vmax.bf16 %v2274_v50, %v678_v40  ;;  %v744_v2 = vmax.bf16 %v2274_v50, %v680_v43  ;;  %v672_v26 = vpack.c.bf16 %v1910_v60, %v1880_v13  ;;  %v735_v44 = vmax.bf16 %v2274_v50, %v671_v19  ;;  %v1429_v40 = vld [vmem:[%s2226_s2 + $0x14] ss:$8 sps:$4 sm:$0xff]   ;;  %v1446_v19 = vld [vmem:[%s2226_s2 + $0x60] ss:$8 sps:$4 sm:$0xff]  }
 0x150   :  { %962 = vmatprep.subr.bf16.mxu0 %v751_v47  ;;  %1075 = vmatprep.subr.bf16.mxu1 %v753_v27  ;;  %v748_v47 = vmax.bf16 %v2274_v50, %v684_v10  ;;  %v676_v27 = vpack.c.bf16 %v1946_v4, %v1932_v9  ;;  %v666_v23 = vpack.c.bf16 %v1860_v34, %v1844_v49  ;;  %v2330_v10 = vld [vmem:[#allocation20_spill] sm:$0xff] }
 0x151   :  { %963 = vmatpush2.bf16.msra.mxu0 %v750_v28  ;;  %1076 = vmatpush2.bf16.msra.mxu1 %v752_v51  ;;  %v739_v28 = vmax.bf16 %v2274_v50, %v675_v36  ;;  %v734_v39 = vmax.bf16 %v2274_v50, %v670_v58  ;;  %v731_v13 = vmax.bf16 %v2274_v50, %v667_v37  ;;  %v1434_v36 = vld [vmem:[%s2226_s2 + $0x20] ss:$8 sps:$4 sm:$0xff]   ;;  %v1435_v43 = vld [vmem:[%s2226_s2 + $0x34] ss:$8 sps:$4 sm:$0xff]  }
 0x152   :  { %964 = vmatprep.subr.bf16.mxu0 %v747_v62  ;;  %1077 = vmatprep.subr.bf16.mxu1 %v749_v35  ;;  %v738_v62 = vmax.bf16 %v2274_v50, %v674_v20  ;;  %v740_v0 = vmax.bf16 %v2274_v50, %v676_v27  ;;  %v736_v63 = vmax.bf16 %v2274_v50, %v672_v26  ;;  %v1426_v35 = vld [vmem:[%s2226_s2] ss:$8 sps:$4 sm:$0xff]   ;;  %v1443_v20 = vld [vmem:[%s2226_s2 + $0x50] ss:$8 sps:$4 sm:$0xff]   ;;  %v1447_v27 = vld [vmem:[%s2226_s2 + $0x74] ss:$8 sps:$4 sm:$0xff]  }
 0x153   :  { %v730_v53 = vmax.bf16 %v2274_v50, %v666_v23  ;;  %v2310_v49 = vpack.c.bf16 %v1829_v29, %v1803_v24  ;;  %v732_v60 = vmax.bf16 %v2274_v50, %v668_v38  ;;  %v2313_v9 = vpack.c.bf16 %v2311_v1, %v2312_v56  ;;  %v2318_v24 = vld [vmem:[#allocation21_spill] sm:$0xff] }
 0x154   :  { %v2316_v4 = vpack.c.bf16 %v2314_v3, %v2315_v31  ;;  %v2319_v29 = vpack.c.bf16 %v2317_v12, %v2318_v24  ;;  %v2322_v48 = vpack.c.bf16 %v2320_v57, %v2321_v61  ;;  %v2325_v25 = vpack.c.bf16 %v2323_v17, %v2324_v46 }
 0x155   :  { %965 = vmatpush2.bf16.msra.mxu0 %v746_v54  ;;  %1078 = vmatpush2.bf16.msra.mxu1 %v748_v47  ;;  %v727_v34 = vmax.bf16 %v2274_v50, %v2310_v49  ;;  %v729_v15 = vmax.bf16 %v2274_v50, %v2313_v9  ;;  %v2328_v55 = vpack.c.bf16 %v2326_v59, %v2327_v33  ;;  %v1431_v54 = vld [vmem:[%s2226_s2 + $0x10] ss:$8 sps:$4 sm:$0xff]   ;;  %v1438_v47 = vld [vmem:[%s2226_s2 + $0x44] ss:$8 sps:$4 sm:$0xff]  }
 0x156   :  { %966 = vmatprep.subr.bf16.mxu0 %v743_v42  ;;  %1079 = vmatprep.subr.bf16.mxu1 %v745_v16  ;;  %v726_v5 = vmax.bf16 %v2274_v50, %v2316_v4  ;;  %v723_v41 = vmax.bf16 %v2274_v50, %v2319_v29  ;;  %v728_v18 = vmax.bf16 %v2274_v50, %v2322_v48  ;;  %v1437_v42 = vld [vmem:[%s2226_s2 + $0x30] ss:$8 sps:$4 sm:$0xff]   ;;  %v1441_v16 = vld [vmem:[%s2226_s2 + $0x54] ss:$8 sps:$4 sm:$0xff]  }
 0x157   :  { %v725_v30 = vmax.bf16 %v2274_v50, %v2325_v25  ;;  %v722_v22 = vmax.bf16 %v2274_v50, %v2328_v55  ;;  %v2331_v51 = vpack.c.bf16 %v2329_v14, %v2330_v10 }
 0x159   :  { %967 = vmatpush2.bf16.msra.mxu0 %v742_v21  ;;  %1080 = vmatpush2.bf16.msra.mxu1 %v744_v2  ;;  %v724_v45 = vmax.bf16 %v2274_v50, %v2331_v51  ;;  %v1432_v50 = vld [vmem:[%s2226_s2 + $0x24] ss:$8 sps:$4 sm:$0xff]  }
 0x15a   :  { %968 = vmatprep.subr.bf16.mxu0 %v739_v28  ;;  %1081 = vmatprep.subr.bf16.mxu1 %v741_v7  ;;  %v1444_v21 = vld [vmem:[%s2226_s2 + $0x64] ss:$8 sps:$4 sm:$0xff]   ;;  %v1449_v28 = vld [vmem:[%s2226_s2 + $0x70] ss:$8 sps:$4 sm:$0xff]   ;;  %s1483_s2 = smov [#allocation2]  }
 0x15b   :  { %s1312_s14 = sshll.u32 %s1483_s2, 4  ;;  %s1313_s14 = int_to_ptr.vmem [resolvable:$true] %s1312_s14 }
 0x15c   :  { %s1458_s15 = scalar_lea.vmem %s1313_s14, 64  ;;  %p1463_p1 = scmp.lt.s32.totalorder %s1313_s14, %s1313_s14 }
 0x15d   :  { %969 = vmatpush2.bf16.msra.mxu0 %v738_v62  ;;  %1082 = vmatpush2.bf16.msra.mxu1 %v740_v0  ;;  %p1459_p0 = scmp.ne.s32.totalorder %s1313_s14, %s1458_s15  ;;  %p1464_p2 = scmp.lt.s32.totalorder %s1458_s15, %s1458_s15 }
 0x15e   :  { %970 = vmatprep.subr.bf16.mxu0 %v735_v44  ;;  %1083 = vmatprep.subr.bf16.mxu1 %v737_v8 }
 0x15f   :  { %p1465_p3 = por %p1464_p2, %p1463_p1 }
 0x161   :  { %971 = vmatpush2.bf16.msra.mxu0 %v734_v39  ;;  %1084 = vmatpush2.bf16.msra.mxu1 %v736_v63  ;;  %p1466_p4 = pnand %p1465_p3, %p1459_p0 }
 0x162   :  { %972 = vmatprep.subr.bf16.mxu0 %v731_v13  ;;  %1085 = vmatprep.subr.bf16.mxu1 %v733_v32 }
 0x165   :  { %973 = vmatpush2.bf16.msra.mxu0 %v730_v53  ;;  %1086 = vmatpush2.bf16.msra.mxu1 %v732_v60 }
 0x166   :  { %974 = vmatprep.subr.bf16.mxu0 %v727_v34  ;;  %1087 = vmatprep.subr.bf16.mxu1 %v729_v15 }
 0x169   :  { %975 = vmatpush2.bf16.msra.mxu0 %v726_v5  ;;  %1088 = vmatpush2.bf16.msra.mxu1 %v728_v18 }
 0x16a   :  { %976 = vmatprep.subr.bf16.mxu0 %v723_v41  ;;  %1089 = vmatprep.subr.bf16.mxu1 %v725_v30 }
 0x16d   :  { %977 = vmatpush2.bf16.msra.mxu0 %v722_v22  ;;  %1090 = vmatpush2.bf16.msra.mxu1 %v724_v45 }
 0x170   :  { %979 = vmatmul.mubr.bf16.vlgmr.msra.gmra.mxu0 %v1426_v35  ;;  %1092 = vmatmul.mubr.bf16.vlgmr.msra.gmra.mxu1 %v1426_v35 }
 0x171   :  { %988 = vmatprep.mubr.bf16.mxu0 %v1429_v40  ;;  %1101 = vmatprep.mubr.bf16.mxu1 %v1429_v40 }
 0x178   :  { %989 = vmatmul.mubr.bf16.gmra.mxu0 %v1431_v54  ;;  %1102 = vmatmul.mubr.bf16.gmra.mxu1 %v1431_v54 }
 0x179   :  { %998 = vmatprep.mubr.bf16.mxu0 %v1432_v50  ;;  %1111 = vmatprep.mubr.bf16.mxu1 %v1432_v50 }
 0x180   :  { %999 = vmatmul.mubr.bf16.gmra.mxu0 %v1434_v36  ;;  %1112 = vmatmul.mubr.bf16.gmra.mxu1 %v1434_v36 }
 0x181   :  { %1008 = vmatprep.mubr.bf16.mxu0 %v1435_v43  ;;  %1121 = vmatprep.mubr.bf16.mxu1 %v1435_v43 }
 0x188   :  { %1009 = vmatmul.mubr.bf16.gmra.mxu0 %v1437_v42  ;;  %1122 = vmatmul.mubr.bf16.gmra.mxu1 %v1437_v42 }
 0x189   :  { %1018 = vmatprep.mubr.bf16.mxu0 %v1438_v47  ;;  %1131 = vmatprep.mubr.bf16.mxu1 %v1438_v47 }
 0x190   :  { %1019 = vmatmul.mubr.bf16.gmra.mxu0 %v1440_v11  ;;  %1132 = vmatmul.mubr.bf16.gmra.mxu1 %v1440_v11 }
 0x191   :  { %1028 = vmatprep.mubr.bf16.mxu0 %v1441_v16  ;;  %1141 = vmatprep.mubr.bf16.mxu1 %v1441_v16 }
 0x198   :  { %1029 = vmatmul.mubr.bf16.gmra.mxu0 %v1443_v20  ;;  %1142 = vmatmul.mubr.bf16.gmra.mxu1 %v1443_v20 }
 0x199   :  { %1038 = vmatprep.mubr.bf16.mxu0 %v1444_v21  ;;  %1151 = vmatprep.mubr.bf16.mxu1 %v1444_v21 }
 0x19e   :  { %v789_v2 = vpop.permute.xlu0 %788  ;;  %v2125_v9 = vpop.permute.xlu1 %828 }
 0x1a0   :  { %1039 = vmatmul.mubr.bf16.gmra.mxu0 %v1446_v19  ;;  %1152 = vmatmul.mubr.bf16.gmra.mxu1 %v1446_v19 }
 0x1a1   :  { %1048 = vmatprep.mubr.bf16.mxu0 %v1447_v27  ;;  %1161 = vmatprep.mubr.bf16.mxu1 %v1447_v27 }
 0x1a2   :  { %v834_v29 = vpop.permute.xlu1 %833 }
 0x1a6   :  { %v794_v44 = vpop.permute.xlu0 %793  ;;  %v2127_v25 = vpop.permute.xlu1 %838 }
 0x1a8   :  { %1049 = vmatmul.mubr.bf16.gmra.mxu0 %v1449_v28  ;;  %1162 = vmatmul.mubr.bf16.gmra.mxu1 %v1449_v28 }
 0x1aa   :  { %v799_v13 = vpop.permute.xlu0 %798  ;;  %v2135_v54 = vpop.permute.xlu1 %843 }
 0x1ae   :  { %v804_v1 = vpop.permute.xlu0 %803 }
 0x1b2   :  { %v809_v12 = vpop.permute.xlu0 %808 }
 0x1b6   :  { %v814_v17 = vpop.permute.xlu0 %813 }
 0x1ba   :  { %v819_v14 = vpop.permute.xlu0 %818 }
 0x230   :  { %v980_v6 = vpop.f32.mrf.mxu0  ;;  %v1093_v7 = vpop.f32.mrf.mxu1 }
 0x231   :  { %v981_v10 = vadd.f32 %v980_v6, %v789_v2  ;;  %v1094_v51 = vadd.f32 %v1093_v7, %v789_v2 }
 0x232   :  { %v982_v58 = vpop.f32.mrf.mxu0  ;;  %v1095_v62 = vpop.f32.mrf.mxu1 }
 0x233   :  { %v2131_v45 = vadd.f32 %v982_v58, %v789_v2  ;;  %v2133_v35 = vadd.f32 %v1095_v62, %v789_v2 }
 0x234   :  { %v984_v37 = vpop.f32.mrf.mxu0  ;;  %v1097_v26 = vpop.f32.mrf.mxu1 }
 0x235   :  { %v985_v50 = vadd.f32 %v984_v37, %v794_v44  ;;  %v1098_v36 = vadd.f32 %v1097_v26, %v794_v44 }
 0x236   :  { %v986_v0 = vpop.f32.mrf.mxu0  ;;  %v1099_v52 = vpop.f32.mrf.mxu1 }
 0x237   :  { %v987_v42 = vadd.f32 %v986_v0, %v794_v44  ;;  %v1100_v47 = vadd.f32 %v1099_v52, %v794_v44 }
 0x238   :  { %v990_v8 = vpop.f32.mrf.mxu0  ;;  %v1103_v23 = vpop.f32.mrf.mxu1 }
 0x239   :  { %v991_v16 = vadd.f32 %v990_v8, %v799_v13  ;;  %v2137_v20 = vadd.f32 %v1103_v23, %v799_v13 }
 0x23a   :  { %v992_v39 = vpop.f32.mrf.mxu0  ;;  %v1105_v38 = vpop.f32.mrf.mxu1 }
 0x23b   :  { %v2139_v21 = vadd.f32 %v992_v39, %v799_v13  ;;  %v2141_v19 = vadd.f32 %v1105_v38, %v799_v13  ;;  %v824_v38 = vpop.permute.xlu0 %823 }
 0x23c   :  { %v994_v63 = vpop.f32.mrf.mxu0  ;;  %v1107_v32 = vpop.f32.mrf.mxu1 }
 0x23d   :  { %v2143_v28 = vadd.f32 %v994_v63, %v804_v1  ;;  %v2145_v2 = vadd.f32 %v1107_v32, %v804_v1 }
 0x23e   :  { %v996_v53 = vpop.f32.mrf.mxu0  ;;  %v1109_v49 = vpop.f32.mrf.mxu1 }
 0x23f   :  { %v2147_v6 = vadd.f32 %v996_v53, %v804_v1  ;;  %v2149_v7 = vadd.f32 %v1109_v49, %v804_v1  ;;  %v849_v53 = vpop.permute.xlu1 %848 }
 0x240   :  { %v1000_v34 = vpop.f32.mrf.mxu0  ;;  %v1113_v60 = vpop.f32.mrf.mxu1 }
 0x241   :  { %v2151_v62 = vadd.f32 %v1000_v34, %v809_v12  ;;  %v2153_v37 = vadd.f32 %v1113_v60, %v809_v12 }
 0x242   :  { %v1002_v56 = vpop.f32.mrf.mxu0  ;;  %v1115_v15 = vpop.f32.mrf.mxu1 }
 0x243   :  { %v2155_v26 = vadd.f32 %v1002_v56, %v809_v12  ;;  %v2157_v44 = vadd.f32 %v1115_v15, %v809_v12 }
 0x244   :  { %v1004_v3 = vpop.f32.mrf.mxu0  ;;  %v1117_v31 = vpop.f32.mrf.mxu1 }
 0x245   :  { %v2159_v52 = vadd.f32 %v1004_v3, %v814_v17  ;;  %v2161_v8 = vadd.f32 %v1117_v31, %v814_v17 }
 0x246   :  { %v1006_v4 = vpop.f32.mrf.mxu0  ;;  %v1119_v5 = vpop.f32.mrf.mxu1 }
 0x247   :  { %v2163_v23 = vadd.f32 %v1006_v4, %v814_v17  ;;  %v2165_v39 = vadd.f32 %v1119_v5, %v814_v17 }
 0x248   :  { %v1010_v24 = vpop.f32.mrf.mxu0  ;;  %v1123_v41 = vpop.f32.mrf.mxu1 }
 0x249   :  { %v2167_v49 = vadd.f32 %v1010_v24, %v819_v14  ;;  %v2169_v34 = vadd.f32 %v1123_v41, %v819_v14 }
 0x24a   :  { %v1012_v57 = vpop.f32.mrf.mxu0  ;;  %v1125_v61 = vpop.f32.mrf.mxu1 }
 0x24b   :  { %v2172_v15 = vadd.f32 %v1012_v57, %v819_v14  ;;  %v2174_v3 = vadd.f32 %v1125_v61, %v819_v14 }
 0x24c   :  { %v1014_v48 = vpop.f32.mrf.mxu0  ;;  %v1127_v18 = vpop.f32.mrf.mxu1 }
 0x24d   :  { %v2177_v12 = vadd.f32 %v1014_v48, %v824_v38  ;;  %v2179_v17 = vadd.f32 %v1127_v18, %v824_v38 }
 0x24e   :  { %v1016_v46 = vpop.f32.mrf.mxu0  ;;  %v2129_v30 = vpop.f32.mrf.mxu1 }
 0x250   :  { %v1020_v59 = vpop.f32.mrf.mxu0  ;;  %v1133_v33 = vpop.f32.mrf.mxu1 }
 0x251   :  { %v1021_v60 = vadd.f32 %v1020_v59, %v2125_v9  ;;  %v1134_v31 = vadd.f32 %v1133_v33, %v2125_v9 }
 0x252   :  { %v1022_v55 = vpop.f32.mrf.mxu0  ;;  %v1135_v22 = vpop.f32.mrf.mxu1 }
 0x253   :  { %v1023_v24 = vadd.f32 %v1022_v55, %v2125_v9  ;;  %v1136_v41 = vadd.f32 %v1135_v22, %v2125_v9  ;;  %v1172_v48 = vmul.f32 %v1021_v60, %v981_v10  ;;  %v1174_v22 = vmul.f32 %v1134_v31, %v1094_v51 }
 0x254   :  { %v1024_v40 = vpop.f32.mrf.mxu0  ;;  %v1137_v43 = vpop.f32.mrf.mxu1 }
 0x255   :  { %v1025_v13 = vadd.f32 %v1024_v40, %v834_v29  ;;  %v1138_v63 = vadd.f32 %v1137_v43, %v834_v29  ;;  %v2184_v43 = vadd.f32 %v1016_v46, %v824_v38 }
 0x256   :  { %v1026_v11 = vpop.f32.mrf.mxu0  ;;  %v1139_v27 = vpop.f32.mrf.mxu1 }
 0x257   :  { %v1027_v1 = vadd.f32 %v1026_v11, %v834_v29  ;;  %v1140_v4 = vadd.f32 %v1139_v27, %v834_v29  ;;  %v1176_v57 = vmul.f32 %v1025_v13, %v985_v50  ;;  %v1178_v61 = vmul.f32 %v1138_v63, %v1098_v36 }
 0x258   :  { %v1030_v58 = vpop.f32.mrf.mxu0  ;;  %v1143_v0 = vpop.f32.mrf.mxu1  ;;  %v2188_v29 = vadd.f32 %v2129_v30, %v824_v38  ;;  %v1175_v30 = vmul.f32 %v1136_v41, %v2133_v35 }
 0x259   :  { %v1031_v59 = vadd.f32 %v1030_v58, %v2127_v25  ;;  %v1144_v14 = vadd.f32 %v1143_v0, %v2127_v25  ;;  %v1177_v18 = vmul.f32 %v1027_v1, %v987_v42  ;;  %v1179_v27 = vmul.f32 %v1140_v4, %v1100_v47  ;;  %v854_v58 = vpop.permute.xlu1 %853 }
 0x25a   :  { %v1032_v32 = vpop.f32.mrf.mxu0  ;;  %v1145_v56 = vpop.f32.mrf.mxu1  ;;  %v1173_v0 = vmul.f32 %v1023_v24, %v2131_v45  ;;  %v1204_v13 = vadd.f32 %v1176_v57, %v1172_v48  ;;  %v1230_v63 = vadd.f32 %v1178_v61, %v1174_v22 }
 0x25b   :  { %v1033_v11 = vadd.f32 %v1032_v32, %v2127_v25  ;;  %v1146_v55 = vadd.f32 %v1145_v56, %v2127_v25  ;;  %v1180_v38 = vmul.f32 %v1031_v59, %v991_v16  ;;  %v1182_v25 = vmul.f32 %v1144_v14, %v2137_v20 }
 0x25c   :  { %v1034_v5 = vpop.f32.mrf.mxu0  ;;  %v1147_v40 = vpop.f32.mrf.mxu1  ;;  %v1217_v32 = vadd.f32 %v1177_v18, %v1173_v0  ;;  %v1243_v31 = vadd.f32 %v1179_v27, %v1175_v30 }
 0x25d   :  { %v1035_v46 = vadd.f32 %v1034_v5, %v2135_v54  ;;  %v1148_v50 = vadd.f32 %v1147_v40, %v2135_v54  ;;  %v1181_v60 = vmul.f32 %v1033_v11, %v2139_v21  ;;  %v1183_v1 = vmul.f32 %v1146_v55, %v2141_v19  ;;  %v859_v14 = vpop.permute.xlu1 %858 }
 0x25e   :  { %v1036_v33 = vpop.f32.mrf.mxu0  ;;  %v1149_v9 = vpop.f32.mrf.mxu1  ;;  %v1205_v24 = vadd.f32 %v1204_v13, %v1180_v38  ;;  %v1231_v40 = vadd.f32 %v1230_v63, %v1182_v25 }
 0x25f   :  { %v1037_v10 = vadd.f32 %v1036_v33, %v2135_v54  ;;  %v1150_v51 = vadd.f32 %v1149_v9, %v2135_v54  ;;  %v1184_v35 = vmul.f32 %v1035_v46, %v2143_v28  ;;  %v1186_v16 = vmul.f32 %v1148_v50, %v2145_v2 }
 0x260   :  { %v1040_v36 = vpop.f32.mrf.mxu0  ;;  %v1153_v42 = vpop.f32.mrf.mxu1  ;;  %v1218_v33 = vadd.f32 %v1217_v32, %v1181_v60  ;;  %v1244_v48 = vadd.f32 %v1243_v31, %v1183_v1 }
 0x261   :  { %v1041_v56 = vadd.f32 %v1040_v36, %v849_v53  ;;  %v1154_v4 = vadd.f32 %v1153_v42, %v849_v53  ;;  %v1185_v20 = vmul.f32 %v1037_v10, %v2147_v6  ;;  %v1187_v21 = vmul.f32 %v1150_v51, %v2149_v7  ;;  %v864_v51 = vpop.permute.xlu1 %863 }
 0x262   :  { %v1042_v47 = vpop.f32.mrf.mxu0  ;;  %v1155_v45 = vpop.f32.mrf.mxu1  ;;  %v1206_v11 = vadd.f32 %v1205_v24, %v1184_v35  ;;  %v1232_v55 = vadd.f32 %v1231_v40, %v1186_v16 }
 0x263   :  { %v1043_v41 = vadd.f32 %v1042_v47, %v849_v53  ;;  %v1156_v57 = vadd.f32 %v1155_v45, %v849_v53  ;;  %v1188_v28 = vmul.f32 %v1041_v56, %v2151_v62  ;;  %v1190_v6 = vmul.f32 %v1154_v4, %v2153_v37 }
 0x264   :  { %v1044_v5 = vpop.f32.mrf.mxu0  ;;  %v1157_v59 = vpop.f32.mrf.mxu1  ;;  %v1219_v27 = vadd.f32 %v1218_v33, %v1185_v20  ;;  %v1245_v36 = vadd.f32 %v1244_v48, %v1187_v21 }
 0x265   :  { %v1045_v54 = vadd.f32 %v1044_v5, %v854_v58  ;;  %v1158_v19 = vadd.f32 %v1157_v59, %v854_v58  ;;  %v1189_v46 = vmul.f32 %v1043_v41, %v2155_v26  ;;  %v1191_v0 = vmul.f32 %v1156_v57, %v2157_v44 }
 0x266   :  { %v1046_v61 = vpop.f32.mrf.mxu0  ;;  %v1159_v18 = vpop.f32.mrf.mxu1  ;;  %v1207_v10 = vadd.f32 %v1206_v11, %v1188_v28  ;;  %v1233_v63 = vadd.f32 %v1232_v55, %v1190_v6 }
 0x267   :  { %v1047_v2 = vadd.f32 %v1046_v61, %v854_v58  ;;  %v1160_v9 = vadd.f32 %v1159_v18, %v854_v58  ;;  %v1192_v7 = vmul.f32 %v1045_v54, %v2159_v52  ;;  %v1194_v62 = vmul.f32 %v1158_v19, %v2161_v8 }
 0x268   :  { %v1050_v22 = vpop.f32.mrf.mxu0  ;;  %v1163_v50 = vpop.f32.mrf.mxu1  ;;  %v1220_v44 = vadd.f32 %v1219_v27, %v1189_v46  ;;  %v1246_v56 = vadd.f32 %v1245_v36, %v1191_v0 }
 0x269   :  { %v1051_v53 = vadd.f32 %v1050_v22, %v859_v14  ;;  %v1164_v30 = vadd.f32 %v1163_v50, %v859_v14  ;;  %v1193_v42 = vmul.f32 %v1047_v2, %v2163_v23  ;;  %v1195_v26 = vmul.f32 %v1160_v9, %v2165_v39 }
 0x26a   :  { %v1052_v38 = vpop.f32.mrf.mxu0  ;;  %v1165_v13 = vpop.f32.mrf.mxu1  ;;  %v1208_v32 = vadd.f32 %v1207_v10, %v1192_v7  ;;  %v1234_v23 = vadd.f32 %v1233_v63, %v1194_v62 }
 0x26b   :  { %v1196_v37 = vmul.f32 %v1051_v53, %v2167_v49  ;;  %v1053_v58 = vadd.f32 %v1052_v38, %v859_v14  ;;  %v1198_v52 = vmul.f32 %v1164_v30, %v2169_v34  ;;  %v1166_v25 = vadd.f32 %v1165_v13, %v859_v14 }
 0x26c   :  { %v1054_v47 = vpop.f32.mrf.mxu0  ;;  %v1167_v1 = vpop.f32.mrf.mxu1  ;;  %v1221_v35 = vadd.f32 %v1220_v44, %v1193_v42  ;;  %v1247_v5 = vadd.f32 %v1246_v56, %v1195_v26  ;;  %v1281_v13 = vlaneseq }
 0x26d   :  { %v1197_v8 = vmul.f32 %v1053_v58, %v2172_v15  ;;  %v1055_v60 = vadd.f32 %v1054_v47, %v864_v51  ;;  %v1199_v49 = vmul.f32 %v1166_v25, %v2174_v3  ;;  %v1168_v45 = vadd.f32 %v1167_v1, %v864_v51 }
 0x26e   :  { %v1056_v31 = vpop.f32.mrf.mxu0  ;;  %v1209_v16 = vadd.f32 %v1208_v32, %v1196_v37  ;;  %v1169_v4 = vpop.f32.mrf.mxu1  ;;  %v1235_v24 = vadd.f32 %v1234_v23, %v1198_v52  ;;  %v1482_v37 = vmov 1966171168   ;;  %vm1303_vm3 = vcmp.lt.s32.totalorder %v1281_v13, 512 }
 0x26f   :  { %v1200_v39 = vmul.f32 %v1055_v60, %v2177_v12  ;;  %v1057_v34 = vadd.f32 %v1056_v31, %v864_v51  ;;  %v1202_v20 = vmul.f32 %v1168_v45, %v2179_v17  ;;  %v1170_v41 = vadd.f32 %v1169_v4, %v864_v51 }
 0x270   :  { %v1222_v15 = vadd.f32 %v1221_v35, %v1197_v8  ;;  %v1248_v40 = vadd.f32 %v1247_v5, %v1199_v49  ;;  %v1279_v58 = vunpack.c.l.s4 %v1482_v37  ;;  %v1282_v51 = vshrl.u32 %v1281_v13, 7 }
 0x271   :  { %v1210_v54 = vadd.f32 %v1209_v16, %v1200_v39  ;;  %v1201_v59 = vmul.f32 %v1057_v34, %v2184_v43  ;;  %v1236_v21 = vadd.f32 %v1235_v24, %v1202_v20  ;;  %v1203_v3 = vmul.f32 %v1170_v41, %v2188_v29 }
 0x272   :  { %v1280_v25 = vunpack.c.0.s8 %v1279_v58 }
 0x273   :  { %v1211_v57 = vrot.slane %v1210_v54, 4  ;;  %v1223_v19 = vadd.f32 %v1222_v15, %v1201_v59  ;;  %v1237_v61 = vrot.slane %v1236_v21, 4  ;;  %v1249_v14 = vadd.f32 %v1248_v40, %v1203_v3 }
 0x274   :  { %v1283_v23 = vsub.s32 %v1280_v25, %v1282_v51 }
 0x275   :  { %v1212_v12 = vadd.f32 %v1211_v57, %v1210_v54  ;;  %v1224_v33 = vrot.slane %v1223_v19, 4  ;;  %v1238_v48 = vadd.f32 %v1237_v61, %v1236_v21  ;;  %v1250_v28 = vrot.slane %v1249_v14, 4 }
 0x277   :  { %v1213_v2 = vrot.slane %v1212_v12, 2  ;;  %v1225_v18 = vadd.f32 %v1224_v33, %v1223_v19  ;;  %v1239_v17 = vrot.slane %v1238_v48, 2  ;;  %v1251_v11 = vadd.f32 %v1250_v28, %v1249_v14 }
 0x279   :  { %v1214_v55 = vadd.f32 %v1213_v2, %v1212_v12  ;;  %v1226_v6 = vrot.slane %v1225_v18, 2  ;;  %v1240_v9 = vadd.f32 %v1239_v17, %v1238_v48  ;;  %v1252_v43 = vrot.slane %v1251_v11, 2 }
 0x27b   :  { %v1215_v22 = vrot.slane %v1214_v55, 1  ;;  %v1227_v27 = vadd.f32 %v1226_v6, %v1225_v18  ;;  %v1241_v46 = vrot.slane %v1240_v9, 1  ;;  %v1253_v29 = vadd.f32 %v1252_v43, %v1251_v11 }
 0x27d   :  { %v1216_v7 = vadd.f32 %v1215_v22, %v1214_v55  ;;  %v1228_v53 = vrot.slane %v1227_v27, 1  ;;  %v1242_v50 = vadd.f32 %v1241_v46, %v1240_v9  ;;  %v1254_v36 = vrot.slane %v1253_v29, 1 }
 0x27f   :  { %v1256_v0 = vmul.f32 0.5, %v1216_v7  ;;  %v1229_v62 = vadd.f32 %v1228_v53, %v1227_v27  ;;  %v1258_v30 = vmul.f32 0.5, %v1242_v50  ;;  %v1255_v38 = vadd.f32 %v1254_v36, %v1253_v29 }
 0x281   :  { %1450 = vtanh.f32 %v1256_v0  ;;  %v1257_v10 = vmul.f32 0.5, %v1229_v62  ;;  %v1259_v42 = vmul.f32 0.5, %v1255_v38 }
 0x282   :  { %1452 = vtanh.f32 %v1258_v30 }
 0x283   :  { %1454 = vtanh.f32 %v1257_v10 }
 0x284   :  { %1456 = vtanh.f32 %v1259_v42 }
 0x28e   :  { %v1451_v63 = vpop.eup %1450 }
 0x28f   :  { %v1453_v26 = vpop.eup %1452  ;;  %v1264_v52 = vmul.f32 0.5, %v1451_v63 }
 0x290   :  { %v1455_v47 = vpop.eup %1454  ;;  %v1266_v44 = vmul.f32 0.5, %v1453_v26 }
 0x291   :  { %v1457_v32 = vpop.eup %1456  ;;  %v1265_v8 = vmul.f32 0.5, %v1455_v47  ;;  %v1268_v1 = vadd.f32 0.5, %v1264_v52 }
 0x292   :  { %v1267_v60 = vmul.f32 0.5, %v1457_v32  ;;  %v1270_v49 = vadd.f32 0.5, %v1266_v44 }
 0x293   :  { %v1269_v56 = vadd.f32 0.5, %v1265_v8 }
 0x294   :  { %v1271_v45 = vadd.f32 0.5, %v1267_v60 }
 0x295   :  { %v1276_v31 = vcombine.low %v1268_v1, %v1269_v56 }
 0x296   :  { %v1277_v35 = vcombine.low %v1270_v49, %v1271_v45 }
 0x297   :  { %v1284_v16 = vrot.slane %v1276_v31, %v1283_v23 }
 0x298   :  { %v1291_v39 = vrot.slane %v1277_v35, %v1283_v23 }
 0x29a   :  { %v1292_v34 = vcombine.low %v1284_v16, %v1291_v39 }
 0x29c   :  { %v1299_v4 = vrot.slane %v1292_v34, %v1283_v23 }
 0x29e   :  { %1305 = vst.msk [vmem:[#allocation2] sm:$0xf] %vm1303_vm3, %v1299_v4 }
 0x29f   :  { %1469 = shalt.err (!%p1466_p4)
}
 0x2a0   :  { %1315 = dma.vmem_to_hbm [thread:$0]  %s1313_s14, 64, %s2228_s4, [#allocation3]  }
 0x2a1   :  { %1478 = dma.done.wait [#allocation3], 64  }
 0x2a2   :  { %1479 = vsyncadd [#allocation3], 4294967232 }
 0x2a3   :  { %1319 = vsyncpa [#allocation3], 1 }

</bundles_post_ra>
